<compile_context>
chip_gen: v7x
topology: tpu7x:2x2x1
jax: 0.10.0
libtpu: 0.0.40
codegen_flags: <defaults>
</compile_context>

<pallas_src>
import math

import jax
import jax.numpy as jnp
from jax.experimental import pallas as pl
from jax.experimental.pallas import tpu as pltpu


# ----------------------------------------------------------------------------- ramps
def _log_rampup(current, rampup_length):
    """ramps.log_rampup : 1 - exp(-5 * current / rampup_length)."""
    if rampup_length == 0:
        return 1.0
    current = max(0.0, min(float(current), float(rampup_length)))
    return float(1.0 - math.exp(-5.0 * current / rampup_length))


# -------------------------------------------------------------------- kernel 1: per-pixel
def _make_perpixel_kernel(ignore_index, has_weight):
    """Build the per-pixel kernel; `ignore_index` is static, weight path is compiled only
    when a class-weight vector is supplied."""

    def body(logits_ref, tgt_ref, w_ref, out_ref):
        logits = logits_ref[...].astype(jnp.float32)          # (C, TP) — cast in-vreg
        tgt = tgt_ref[...]                                     # (1, TP) int32

        valid = tgt != ignore_index                            # (1, TP) bool
        tmp_tgt = jnp.where(valid, tgt, 0)                     # ignore_index -> class 0

        # log-softmax over the class (sublane) axis
        m = jnp.max(logits, axis=0, keepdims=True)             # (1, TP)
        z = logits - m
        lse = jnp.log(jnp.sum(jnp.exp(z), axis=0, keepdims=True))
        logp = z - lse                                         # (C, TP)

        cls = jax.lax.broadcasted_iota(jnp.int32, logits.shape, 0)   # (C, TP)
        onehot = cls == tmp_tgt                                      # (C, TP)
        logp_t = jnp.sum(jnp.where(onehot, logp, 0.0), axis=0, keepdims=True)  # (1, TP)

        if has_weight:
            w_t = jnp.sum(jnp.where(onehot, w_ref[...], 0.0), axis=0, keepdims=True)
        else:
            w_t = 1.0

        prob = jnp.where(valid, jnp.exp(logp_t), 2.0)          # sentinel > any threshold (<=1)
        loss = jnp.where(valid, -w_t * logp_t, 0.0)

        out_ref[0:1, :] = prob
        out_ref[1:2, :] = loss

    if has_weight:
        def kernel(logits_ref, tgt_ref, w_ref, out_ref):
            body(logits_ref, tgt_ref, w_ref, out_ref)
    else:
        def kernel(logits_ref, tgt_ref, out_ref):
            body(logits_ref, tgt_ref, None, out_ref)
    return kernel


# ------------------------------------------------------------ kernel 2: select + reduce
def _select_reduce_kernel(thr_ref, probloss_ref, part_ref):
    """Per grid step: partial sum(loss) and count over pixels with prob < threshold.
    Ignored / padded pixels carry prob = 2.0 and can never pass (threshold <= 1)."""
    thr = thr_ref[0, 0]
    prob = probloss_ref[0:1, :]                                # (1, TP)
    loss = probloss_ref[1:2, :]                                # (1, TP)
    sel = prob < thr

    s = jnp.sum(jnp.where(sel, loss, 0.0), axis=1, keepdims=True)     # (1, 1)
    c = jnp.sum(sel.astype(jnp.float32), axis=1, keepdims=True)       # (1, 1)

    part_ref[0:1, :] = jnp.broadcast_to(s, (1, 128))
    part_ref[1:2, :] = jnp.broadcast_to(c, (1, 128))


# ----------------------------------------------------------------------------- wrapper
def abce_loss(predict, target, ignore_index, curr_iter, epoch, *,
              iters_per_epoch, epochs, num_classes, weight=None,
              reduction="mean", thresh=0.7, min_kept=1, ramp_type="log_rampup",
              tile_p=4096):
    """predict: (N, C, H, W) logits (any float dtype); target: (N, H, W) int labels."""
    N, C, H, W = predict.shape
    HW = H * W

    # Free views — no transpose, no upcast (f32 softmax happens inside the kernel).
    logits = predict.reshape(N, C, HW)
    tgt = target.reshape(N, 1, HW).astype(jnp.int32)

    # Tile sizing: multiple of 128, capped by the pixel extent and a VMEM budget so the
    # double-buffered pipeline fits comfortably on v5e/v6e/v7x.
    bytes_per_pix = C * logits.dtype.itemsize + 4 + 2 * 4      # logits + target + fused out
    vmem_budget = 12 * 1024 * 1024
    cap = max(128, (vmem_budget // (2 * bytes_per_pix)) // 128 * 128)
    tile = min(int(tile_p), cap, (HW + 127) // 128 * 128)
    tile = max(128, tile // 128 * 128)

    hw_pad = ((HW + tile - 1) // tile) * tile
    if hw_pad != HW:
        logits = jnp.pad(logits, ((0, 0), (0, 0), (0, hw_pad - HW)))
        tgt = jnp.pad(tgt, ((0, 0), (0, 0), (0, hw_pad - HW)),
                      constant_values=ignore_index)
    num_j = hw_pad // tile
    grid = (N, num_j)

    has_weight = weight is not None
    in_specs = [
        pl.BlockSpec((None, C, tile), lambda n, j: (n, 0, j)),
        pl.BlockSpec((None, 1, tile), lambda n, j: (n, 0, j)),
    ]
    args = [logits, tgt]
    if has_weight:
        w_vec = jnp.asarray(weight, jnp.float32).reshape(C, 1)
        in_specs.append(pl.BlockSpec((C, 1), lambda n, j: (0, 0)))
        args.append(w_vec)

    cparams = pltpu.CompilerParams(
        dimension_semantics=("parallel", "parallel"),
        vmem_limit_bytes=32 * 1024 * 1024)

    prob_loss = pl.pallas_call(
        _make_perpixel_kernel(int(ignore_index), has_weight),
        out_shape=jax.ShapeDtypeStruct((N, 2, hw_pad), jnp.float32),
        grid_spec=pltpu.PrefetchScalarGridSpec(
            num_scalar_prefetch=0,
            grid=grid,
            in_specs=in_specs,
            out_specs=pl.BlockSpec((None, 2, tile), lambda n, j: (n, 0, j)),
        ),
        compiler_params=cparams,
    )(*args)

    # ---- annealed threshold (scalar, computed in Python like the module does)
    if ramp_type is not None:
        start = 1.0 / num_classes
        end = 0.9
        total_num_iters = (epochs - 0.6 * epochs) * iters_per_epoch
        cur_total_iter = iters_per_epoch * epoch + curr_iter
        th = _log_rampup(cur_total_iter, total_num_iters) * (end - start) + start
    else:
        th = thresh

    # ---- bootstrapping threshold: (batch_kept)-th entry of the ascending valid probs.
    # Only the batch_kept+1 smallest probs are needed, so use lax.top_k on negated probs
    # (invalid/padded pixels carry sentinel 2.0 and sort to the end) instead of a full sort.
    # TODO(synk): the k-th order statistic itself has no clean Pallas TPU equivalent; this
    # tiny top_k is plain-JAX glue between the two pallas_calls.
    batch_kept = int(min_kept) * N
    probs_flat = prob_loss[:, 0, :].reshape(-1)
    num_valid = jnp.sum((target != ignore_index).astype(jnp.int32))
    k_sel = min(batch_kept + 1, probs_flat.shape[0])
    neg_top, _ = jax.lax.top_k(-probs_flat, k_sel)
    smallest = -neg_top                                        # ascending smallest probs
    idx = jnp.clip(jnp.minimum(batch_kept, num_valid - 1), 0, k_sel - 1)
    min_threshold = jnp.where(num_valid > 0, smallest[idx], 0.0)
    threshold = jnp.maximum(min_threshold, jnp.float32(th))

    thr_arr = threshold.reshape(1, 1).astype(jnp.float32)
    nb = N * num_j

    parts = pl.pallas_call(
        _select_reduce_kernel,
        out_shape=jax.ShapeDtypeStruct((2, nb * 128), jnp.float32),
        grid_spec=pltpu.PrefetchScalarGridSpec(
            num_scalar_prefetch=0,
            grid=grid,
            in_specs=[
                pl.BlockSpec((1, 1), lambda n, j: (0, 0)),
                pl.BlockSpec((None, 2, tile), lambda n, j: (n, 0, j)),
            ],
            out_specs=pl.BlockSpec((2, 128), lambda n, j: (0, n * num_j + j)),
        ),
        compiler_params=cparams,
    )(thr_arr, prob_loss)

    parts = parts.reshape(2, nb, 128)[:, :, 0]
    total = jnp.sum(parts[0])
    count = jnp.sum(parts[1])

    if reduction == "sum":
        return total
    elif reduction == "mean":
        # PyTorch: returns .sum() (== 0) when nothing is selected, else plain mean.
        return jnp.where(count > 0, total / jnp.maximum(count, 1.0), total)
    else:
        raise NotImplementedError("Reduction Error!")


# ----------------------------------------------------------------- pure-JAX reference
def _abce_loss_reference(predict, target, ignore_index, curr_iter, epoch, *,
                         iters_per_epoch, epochs, num_classes, weight=None,
                         min_kept=1, reduction="mean", thresh=0.7,
                         ramp_type="log_rampup"):
    N, C, H, W = predict.shape
    batch_kept = min_kept * N
    logits = predict.astype(jnp.float32)

    prob_out = jax.nn.softmax(logits, axis=1)
    tmp = jnp.where(target == ignore_index, 0, target)
    prob = jnp.take_along_axis(prob_out, tmp[:, None], axis=1)[:, 0]       # (N,H,W)
    logp = jax.nn.log_softmax(logits, axis=1)
    nll = -jnp.take_along_axis(logp, tmp[:, None], axis=1)[:, 0]
    if weight is not None:
        w = jnp.asarray(weight, jnp.float32)
        nll = nll * w[tmp]
    loss = jnp.where(target == ignore_index, 0.0, nll)

    mask = (target.reshape(-1) != ignore_index)
    probs_flat = prob.reshape(-1)
    num_valid = jnp.sum(mask.astype(jnp.int32))
    sorted_probs = jnp.sort(jnp.where(mask, probs_flat, jnp.inf))
    k = jnp.clip(jnp.minimum(batch_kept, num_valid - 1), 0, probs_flat.shape[0] - 1)
    min_threshold = jnp.where(num_valid > 0, sorted_probs[k], 0.0)

    if ramp_type is not None:
        start = 1.0 / num_classes
        end = 0.9
        total_num_iters = (epochs - 0.6 * epochs) * iters_per_epoch
        th = (_log_rampup(iters_per_epoch * epoch + curr_iter, total_num_iters)
              * (end - start) + start)
    else:
        th = thresh
    threshold = jnp.maximum(min_threshold, jnp.float32(th))

    sel = mask & (probs_flat < threshold)
    total = jnp.sum(jnp.where(sel, loss.reshape(-1), 0.0))
    count = jnp.sum(sel.astype(jnp.float32))
    if reduction == "sum":
        return total
    return jnp.where(count > 0, total / jnp.maximum(count, 1.0), total)


if __name__ == "__main__":
    # module hyper-parameters (deterministic, in-script)
    iters_per_epoch = 10
    epochs = 10
    num_classes = 4
    min_kept = 1
    ignore_index = 255
    curr_iter = 3
    epoch = 1

    key = jax.random.PRNGKey(0)
    k1, k2, k3 = jax.random.split(key, 3)
    N, C, H, W = 2, num_classes, 16, 16
    predict = jax.random.normal(k1, (N, C, H, W), dtype=jnp.float32)
    target = jax.random.randint(k2, (N, H, W), 0, C, dtype=jnp.int32)
    ignore_mask = jax.random.uniform(k3, (N, H, W)) < 0.1
    target = jnp.where(ignore_mask, ignore_index, target)

    common = dict(iters_per_epoch=iters_per_epoch, epochs=epochs,
                  num_classes=num_classes, min_kept=min_kept,
                  ramp_type="log_rampup", reduction="mean")

    # --- unweighted path
    out = abce_loss(predict, target, ignore_index, curr_iter, epoch,
                    weight=None, **common)
    out = jax.block_until_ready(out)
    ref = _abce_loss_reference(predict, target, ignore_index, curr_iter, epoch,
                               weight=None, **common)
    ref = jax.block_until_ready(ref)
    assert jnp.allclose(out, ref, rtol=1e-5, atol=1e-5), (out, ref)

    # --- class-weighted path
    wvec = [0.5, 1.0, 2.0, 1.5]
    out_w = abce_loss(predict, target, ignore_index, curr_iter, epoch,
                      weight=wvec, **common)
    out_w = jax.block_until_ready(out_w)
    ref_w = _abce_loss_reference(predict, target, ignore_index, curr_iter, epoch,
                                 weight=wvec, **common)
    ref_w = jax.block_until_ready(ref_w)
    assert jnp.allclose(out_w, ref_w, rtol=1e-5, atol=1e-5), (out_w, ref_w)

    print("KERNEL_OK")
</pallas_src>

<mosaic_0001>
module attributes {stable_mosaic.version = 11 : i64} {
  func.func @kernel(%arg0: i32, %arg1: i32, %arg2: memref<1x4x256xf32, #tpu.memory_space<vmem>>, %arg3: memref<1x1x256xi32, #tpu.memory_space<vmem>>, %arg4: memref<1x2x256xf32, #tpu.memory_space<vmem>>) attributes {dimension_semantics = [#tpu.dimension_semantics<parallel>, #tpu.dimension_semantics<parallel>], iteration_bounds = array<i64: 2, 1>, scalar_prefetch = 0 : i64, scratch_operands = 0 : i64, tpu.core_type = #tpu.core_type<tc>, window_params = [{transform_indices = @transform_0, window_bounds = array<i64: 1, 4, 256>}, {transform_indices = @transform_1, window_bounds = array<i64: 1, 1, 256>}, {transform_indices = @transform_2, window_bounds = array<i64: 1, 2, 256>}]} {
    %c0 = arith.constant 0 : index
    %c0_0 = arith.constant 0 : index
    %c0_1 = arith.constant 0 : index
    %0 = vector.load %arg2[%c0, %c0_0, %c0_1] : memref<1x4x256xf32, #tpu.memory_space<vmem>>, vector<1x4x256xf32>
    %1 = vector.shape_cast %0 : vector<1x4x256xf32> to vector<4x256xf32>
    %c0_2 = arith.constant 0 : index
    %c0_3 = arith.constant 0 : index
    %c0_4 = arith.constant 0 : index
    %2 = vector.load %arg3[%c0_2, %c0_3, %c0_4] : memref<1x1x256xi32, #tpu.memory_space<vmem>>, vector<1x1x256xi32>
    %3 = vector.shape_cast %2 : vector<1x1x256xi32> to vector<1x256xi32>
    %c255_i32 = arith.constant 255 : i32
    %4 = vector.broadcast %c255_i32 : i32 to vector<1x256xi32>
    %5 = arith.cmpi ne, %3, %4 : vector<1x256xi32>
    %c0_i32 = arith.constant 0 : i32
    %6 = vector.broadcast %c0_i32 : i32 to vector<1x256xi32>
    %7 = arith.select %5, %3, %6 : vector<1x256xi1>, vector<1x256xi32>
    %cst = arith.constant dense<0xFF800000> : vector<256xf32>
    %8 = vector.multi_reduction <maximumf>, %1, %cst [0] : vector<4x256xf32> to vector<256xf32>
    %9 = vector.shape_cast %8 : vector<256xf32> to vector<1x256xf32>
    %10 = vector.broadcast %9 : vector<1x256xf32> to vector<4x256xf32>
    %11 = arith.subf %1, %10 : vector<4x256xf32>
    %12 = math.exp %11 : vector<4x256xf32>
    %cst_5 = arith.constant dense<0.000000e+00> : vector<256xf32>
    %13 = vector.multi_reduction <add>, %12, %cst_5 [0] : vector<4x256xf32> to vector<256xf32>
    %14 = vector.shape_cast %13 : vector<256xf32> to vector<1x256xf32>
    %15 = math.log %14 : vector<1x256xf32>
    %16 = vector.broadcast %15 : vector<1x256xf32> to vector<4x256xf32>
    %17 = arith.subf %11, %16 : vector<4x256xf32>
    %18 = tpu.iota {dimensions = array<i32: 0>} : vector<4x256xi32>
    %19 = vector.broadcast %7 : vector<1x256xi32> to vector<4x256xi32>
    %20 = arith.cmpi eq, %18, %19 : vector<4x256xi32>
    %cst_6 = arith.constant 0.000000e+00 : f32
    %21 = vector.broadcast %cst_6 : f32 to vector<4x256xf32>
    %22 = arith.select %20, %17, %21 : vector<4x256xi1>, vector<4x256xf32>
    %cst_7 = arith.constant dense<0.000000e+00> : vector<256xf32>
    %23 = vector.multi_reduction <add>, %22, %cst_7 [0] : vector<4x256xf32> to vector<256xf32>
    %24 = vector.shape_cast %23 : vector<256xf32> to vector<1x256xf32>
    %25 = math.exp %24 : vector<1x256xf32>
    %cst_8 = arith.constant 2.000000e+00 : f32
    %26 = vector.broadcast %cst_8 : f32 to vector<1x256xf32>
    %27 = arith.select %5, %25, %26 : vector<1x256xi1>, vector<1x256xf32>
    %cst_9 = arith.constant -1.000000e+00 : f32
    %28 = vector.broadcast %cst_9 : f32 to vector<1x256xf32>
    %29 = arith.mulf %28, %24 : vector<1x256xf32>
    %cst_10 = arith.constant 0.000000e+00 : f32
    %30 = vector.broadcast %cst_10 : f32 to vector<1x256xf32>
    %31 = arith.select %5, %29, %30 : vector<1x256xi1>, vector<1x256xf32>
    %c0_11 = arith.constant 0 : index
    %c0_12 = arith.constant 0 : index
    %c0_13 = arith.constant 0 : index
    %32 = vector.load %arg4[%c0_11, %c0_12, %c0_13] : memref<1x2x256xf32, #tpu.memory_space<vmem>>, vector<1x1x256xf32>
    %33 = vector.shape_cast %32 : vector<1x1x256xf32> to vector<1x256xf32>
    %34 = vector.shape_cast %27 : vector<1x256xf32> to vector<1x1x256xf32>
    tpu.vector_store %arg4[%c0_11, %c0_12, %c0_13], %34 {strides = array<i32>} : memref<1x2x256xf32, #tpu.memory_space<vmem>>, vector<1x1x256xf32>,
    %c0_14 = arith.constant 0 : index
    %c1 = arith.constant 1 : index
    %c0_15 = arith.constant 0 : index
    %35 = vector.load %arg4[%c0_14, %c1, %c0_15] : memref<1x2x256xf32, #tpu.memory_space<vmem>>, vector<1x1x256xf32>
    %36 = vector.shape_cast %35 : vector<1x1x256xf32> to vector<1x256xf32>
    %37 = vector.shape_cast %31 : vector<1x256xf32> to vector<1x1x256xf32>
    tpu.vector_store %arg4[%c0_14, %c1, %c0_15], %37 {strides = array<i32>} : memref<1x2x256xf32, #tpu.memory_space<vmem>>, vector<1x1x256xf32>,
    return
  }
  func.func @transform_0(%arg0: i32, %arg1: i32) -> (i32, i32, i32) {
    %c0_i32 = arith.constant 0 : i32
    %c0_i32_0 = arith.constant 0 : i32
    return %arg0, %c0_i32, %arg1 : i32, i32, i32
  }
  func.func @transform_1(%arg0: i32, %arg1: i32) -> (i32, i32, i32) {
    %c0_i32 = arith.constant 0 : i32
    %c0_i32_0 = arith.constant 0 : i32
    return %arg0, %c0_i32, %arg1 : i32, i32, i32
  }
  func.func @transform_2(%arg0: i32, %arg1: i32) -> (i32, i32, i32) {
    %c0_i32 = arith.constant 0 : i32
    %c0_i32_0 = arith.constant 0 : i32
    return %arg0, %c0_i32, %arg1 : i32, i32, i32
  }
}

</mosaic_0001>

<bundles_post_ra>
// kernel: tpu_custom_call.1
= control target key start
LH: loop header
LB: loop body
LE: loop exit
PB: predicated region body
PF: predicated region fallthrough
CT: control target
= control target key end

     0   :  { %7 = vsyncpa [#allocation3], 0  ;;  %s984_s0 = inlined_call_operand.hbm [shape: f32[2,4,256], index: 0, kind: input, shape index: {}]   ;;  %s985_s1 = inlined_call_operand.hbm [shape: s32[2,1,256], index: 1, kind: input, shape index: {}]   ;;  %s986_s2 = inlined_call_operand.hbm [shape: f32[2,2,256], index: 2, kind: output, shape index: {}]  }
   0x1   :  { %9 = vsyncpa [#allocation3 + $0x1], 0 }
   0x2   :  { %10 = vsyncpa [#allocation6], 0 }
   0x3   :  { %12 = vsyncpa [#allocation6 + $0x1], 0 }
   0x4   :  { %13 = vsyncpa [#allocation4], 0 }
   0x5   :  { %15 = vsyncpa [#allocation4 + $0x1], 0  ;;  %s756_s9 = smov 0   ;;  %s758_s10 = smov 0  }
   0x6   :  { %s760_s11 = smov 0   ;;  %s762_s12 = smov 0  }
   0x7   :  { %s764_s13 = smov 0   ;;  %s766_s14 = smov 0  }
   0x8 LB: > { %s487_s15 = sadd.s32 4294967295, %s735_s14   ;;  %s488_s16 = sadd.s32 4294967294, %s735_s14   ;;  %s735_s14 = sphi %s766_s14, %s21_s14   ;;  %s731_s13 = sphi %s764_s13, %s1006_s13   ;;  %s727_s12 = sphi %s762_s12, %s1005_s12   ;;  %s723_s11 = sphi %s760_s11, %s1004_s11   ;;  %s719_s10 = sphi %s758_s10, %s1003_s10   ;;  %s715_s9 = sphi %s756_s9, %s1002_s9  }
   0x9   : > { %s33_s17 = sadd.s32 1, %s731_s13  ;;  %s42_s18 = sadd.s32 1, %s723_s11 }
   0xa   : > { %p35_p0 = scmp.ge.s32.totalorder %s33_s17, 2  ;;  %p49_p1 = scmp.ne.s32.totalorder %s723_s11, %s719_s10 }
   0xb   : > { %p50_p2 = scmp.eq.s32.totalorder %s735_s14, 0  ;;  %p55_p3 = scmp.ne.s32.totalorder %s719_s10, %s715_s9 }
   0xc   : > { %s1008_s17 = smov (%p35_p0, %s33_s17), 0  ;;  %p56_p5 = scmp.eq.s32.totalorder %s487_s15, 0 }
   0xd   : > { %p797_p4 = por %p50_p2, %p49_p1  ;;  %s37_s20 = ssub.s32 %s731_s13, %s1008_s17 }
   0xe   : > { %p109_p6 = scmp.eq.s32.totalorder %s487_s15, 1  ;;  %p40_p7 = scmp.eq.s32.totalorder %s37_s20, 0 }
   0xf   : > { %p803_p8 = por %p56_p5, %p55_p3  ;;  %p115_p10 = scmp.eq.s32.totalorder %s488_s16, 1 }
  0x10   : > { %p807_p9 = por %p109_p6, %p49_p1  ;;  %p527_p13 = scmp.lt.s32.totalorder %s735_s14, 2 }
  0x11   : > { %s990_s21 = scalar_select %p803_p8, 1, 0 }
  0x12   : > { %s991_s22 = scalar_select %p807_p9, 1, 0 }
  0x13   : > { %s812_s23 = scalar_select %p40_p7, %s723_s11, %s42_s18  }
  0x14   : > { %p814_p11 = por %p115_p10, %p55_p3  ;;  %s821_s25 = sand.u32 1, %s723_s11  }
  0x15   : > { %s491_s26 = sshll.u32 %s821_s25, 3  ;;  %s507_s27 = sshll.u32 %s731_s13, 7 }
  0x16   : > { %s992_s24 = scalar_select %p814_p11, 1, 0 }
  0x17   : > { %s828_s30 = scalar_lea.hbm %s984_s0, %s507_s27  ;;  %s139_s3 = scalar_lea.vmem [#allocation2], %s491_s26 }
  0x18   : > { %s149_s4 = sshll.u32 %s139_s3, 4  ;;  %p834_p0 = pnand %p527_p13, %p797_p4  ;;  %s830_s4 = int_to_ptr.vmem [resolvable:$true] %s149_s4 }
  0x19   : > { %s136_s6 = scalar_lea.sflag [#allocation3], %s821_s25  ;;  %s589_s7 = scalar_lea.hbm %s828_s30, 128 }
  0x1a   : > { %p590_p3 = scmp.ne.s32.totalorder %s828_s30, %s589_s7  ;;  %p591_p5 = pneg %p834_p0 }
  0x1b   : > { %s594_s16 = scalar_lea.hbm %s984_s0, 256  ;;  %p595_p4 = scmp.lt.u32.totalorder %s828_s30, %s984_s0 }
  0x1c   : > { %p592_p6 = pnand %p591_p5, %p590_p3  ;;  %p596_p10 = scmp.lt.u32.totalorder %s594_s16, %s589_s7 }
  0x1d   : > { %p598_p12 = scmp.lt.u32.totalorder %s589_s7, %s828_s30 }
  0x1e   : > { %p593_p7 = pneg %p592_p6  ;;  %p597_p13 = por %p596_p10, %p595_p4 }
  0x20   : > { %p599_p1 = por %p598_p12, %p597_p13 }
  0x22   : > { %p600_p2 = pnand %p599_p1, %p593_p7 }
  0x24   : > { %603 = shalt.err (!%p600_p2)
}
  0x25   : > { %s604_s20 = scalar_lea.vmem %s830_s4, 128  ;;  %s737_s26 = smov [#allocation2]  }
  0x26   : > { %p605_p3 = scmp.ne.s32.totalorder %s830_s4, %s604_s20  ;;  %s609_s27 = sshll.u32 %s737_s26, 4  ;;  %s610_s27 = int_to_ptr.vmem [resolvable:$false] %s609_s27 }
  0x27   : > { %s611_s28 = scalar_lea.vmem %s610_s27, 256  ;;  %p612_p9 = scmp.lt.s32.totalorder %s830_s4, %s610_s27 }
  0x28   : > { %p607_p6 = pnand %p605_p3, %p591_p5  ;;  %p613_p4 = scmp.lt.s32.totalorder %s611_s28, %s604_s20 }
  0x2a   : > { %p608_p11 = pneg %p607_p6  ;;  %p614_p10 = por %p613_p4, %p612_p9 }
  0x2c   : > { %p615_p12 = pnand %p614_p10, %p608_p11 }
  0x2e   : > { %618 = shalt.err (!%p615_p12)
}
  0x2f   : > { %519 = dma.hbm_to_vmem [thread:$0]  (!%p834_p0), %s828_s30, 128, %s830_s4, %s136_s6  }
  0x30   : > { %p994_p1 = scmp.lt.s32.totalorder %s735_s14, 3  ;;  %p995_p2 = scmp.ge.s32.totalorder %s735_s14, 1 }
  0x31   : > { %s494_s3 = sshll.u32 %s821_s25, 1  ;;  %s508_s7 = sshll.u32 %s731_s13, 5 }
  0x32   : > { %p870_p7 = pnand %p995_p2, %p994_p1  ;;  %s879_s16 = scalar_lea.hbm %s985_s1, %s508_s7 }
  0x33   : > { %s160_s18 = scalar_lea.vmem [#allocation5], %s494_s3  ;;  %s157_s30 = scalar_lea.sflag [#allocation6], %s821_s25 }
  0x34   : > { %s996_s29 = scalar_select %p870_p7, 1, 0 }
  0x35   : > { %s170_s19 = sshll.u32 %s160_s18, 4  ;;  %s619_s4 = scalar_lea.hbm %s879_s16, 32  ;;  %s171_s19 = int_to_ptr.vmem [resolvable:$true] %s170_s19 }
  0x36   : > { %p620_p9 = scmp.ne.s32.totalorder %s879_s16, %s619_s4  ;;  %s624_s26 = scalar_lea.hbm %s985_s1, 64 }
  0x37   : > { %p625_p3 = scmp.lt.u32.totalorder %s879_s16, %s985_s1  ;;  %p626_p6 = scmp.lt.u32.totalorder %s624_s26, %s619_s4 }
  0x38   : > { %p622_p11 = pnand %p620_p9, %p591_p5  ;;  %p628_p10 = scmp.lt.u32.totalorder %s619_s4, %s879_s16 }
  0x39   : > { %p627_p4 = por %p626_p6, %p625_p3 }
  0x3a   : > { %p623_p13 = pneg %p622_p11 }
  0x3b   : > { %p629_p12 = por %p628_p10, %p627_p4 }
  0x3d   : > { %p630_p1 = pnand %p629_p12, %p623_p13 }
  0x3f   : > { %633 = shalt.err (!%p630_p1)
}
  0x40   : > { %s634_s25 = scalar_lea.vmem %s171_s19, 32  ;;  %s738_s3 = smov [#allocation5]  }
  0x41   : > { %p635_p2 = scmp.ne.s32.totalorder %s171_s19, %s634_s25  ;;  %s639_s7 = sshll.u32 %s738_s3, 4  ;;  %s640_s7 = int_to_ptr.vmem [resolvable:$false] %s639_s7 }
  0x42   : > { %s641_s8 = scalar_lea.vmem %s640_s7, 64  ;;  %p642_p8 = scmp.lt.s32.totalorder %s171_s19, %s640_s7 }
  0x43   : > { %p637_p9 = pnand %p635_p2, %p591_p5  ;;  %p643_p7 = scmp.lt.s32.totalorder %s641_s8, %s634_s25 }
  0x45   : > { %p638_p11 = pneg %p637_p9  ;;  %p644_p3 = por %p643_p7, %p642_p8 }
  0x47   : > { %p645_p6 = pnand %p644_p3, %p638_p11 }
  0x49   : > { %648 = shalt.err (!%p645_p6)
}
  0x4a   : > { %522 = dma.hbm_to_vmem [thread:$0]  (!%p834_p0), %s879_s16, 32, %s171_s19, %s157_s30  }
  0x4b   : > { %p997_p13 = scmp.ne.s32.totalorder %s996_s29, 0 }
  0x4c   : > { %s904_s15 = sand.u32 (!%p997_p13), 1, %s719_s10   ;;  %p998_p5 = scmp.ne.s32.totalorder (!%p997_p13), %s990_s21, 0 }
  0x4d   : > { %179 = sbr.rel (%p997_p13) target bundleno = 203 (0xcb), region = 28  ;;  %s498_s18 = sshll.u32 (!%p997_p13), %s904_s15, 3 }
  0x4e   : > { %s182_s4 = scalar_lea.sflag (!%p997_p13), [#allocation3], %s904_s15  ;;  %s185_s6 = scalar_lea.vmem (!%p997_p13), [#allocation2], %s498_s18 }
  0x54   : > { %702 = dma.done.wait (%p998_p5), %s182_s4, 128  }
  0x55   : > { %704 = vsyncadd (%p998_p5), %s182_s4, 4294967168  ;;  %s499_s5 = sshll.u32 %s904_s15, 1  ;;  %s191_s29 = scalar_lea.sflag [#allocation6], %s904_s15 }
  0x56   : > { %s914_s16 = scalar_lea.vmem [#allocation5], %s499_s5 }
  0x57   : > { %706 = dma.done.wait (%p998_p5), %s191_s29, 32  }
  0x58   : > { %708 = vsyncadd (%p998_p5), %s191_s29, 4294967264  ;;  %vm230_vm0 = vcmask 1043456   ;;  %v223_v0 = vld [vmem:[%s185_s6] sm:$0xff]  ;;  %v278_v35 = vlaneseq  ;;  %v224_v36 = vld [vmem:[%s914_s16] sm:$0x3]  ;;  %s500_s21 = sshll.u32 %s904_s15, 2 }
  0x59   : > { %v228_v1 = vcombine.high %v223_v0, %v223_v0  ;;  %v231_v2 = vsel %vm230_vm0, %v223_v0, -inf  ;;  %vm225_vm1 = vcmp.ne.s32.totalorder %v224_v36, 255  ;;  %v739_v61 = vmov 1966171168   ;;  %s219_s19 = scalar_lea.vmem [#allocation7], %s500_s21  ;;  %s509_s20 = sshll.u32 %s727_s12, 6 }
  0x5a   : > { %v232_v3 = vrot.slane %v231_v2, 4  ;;  %v279_v37 = vshrl.u32 %v278_v35, 7  ;;  %v226_v39 = vsel %vm225_vm1, %v224_v36, 0  ;;  %v317_v62 = vunpack.c.l.s4 %v739_v61  ;;  %s377_s30 = sshll.u32 %s219_s19, 4  ;;  %s936_s28 = scalar_lea.hbm %s986_s2, %s509_s20  ;;  %s931_s30 = int_to_ptr.vmem [resolvable:$true] %s377_s30 }
  0x5b   : > { %v238_v4 = vsel %vm230_vm0, %v228_v1, -inf  ;;  %vm355_vm4 = vcmp.lt.s32.totalorder %v278_v35, 256  ;;  %s361_s25 = scalar_lea.sflag [#allocation4], %s904_s15  ;;  %s649_s3 = scalar_lea.vmem %s931_s30, 64 }
  0x5c   : > { %v233_v5 = vmax.f32 %v231_v2, %v232_v3  ;;  %v239_v6 = vrot.slane %v238_v4, 4  ;;  %v282_v38 = vsub.s32 0, %v279_v37  ;;  %v286_v41 = vsub.s32 1, %v279_v37  ;;  %p650_p8 = scmp.ne.s32.totalorder %s931_s30, %s649_s3  ;;  %p999_p0 = scmp.ne.s32.totalorder %s991_s22, 0 }
  0x5d   : > { %v318_v3 = vunpack.c.0.s8 %v317_v62  ;;  %s740_s12 = smov [#allocation7]  }
  0x5e   : > { %v234_v7 = vrot.slane %v233_v5, 2  ;;  %v240_v8 = vmax.f32 %v238_v4, %v239_v6  ;;  %v283_v44 = vrot.slane %v226_v39, %v282_v38  ;;  %v287_v46 = vrot.slane %v226_v39, %v286_v41  ;;  %p651_p7 = pnand %p650_p8, %p999_p0  ;;  %s653_s7 = sshll.u32 %s740_s12, 4  ;;  %s654_s7 = int_to_ptr.vmem [resolvable:$false] %s653_s7 }
  0x5f   : > { %s655_s8 = scalar_lea.vmem %s654_s7, 128  ;;  %p656_p10 = scmp.lt.s32.totalorder %s931_s30, %s654_s7 }
  0x60   : > { %v235_v9 = vmax.f32 %v233_v5, %v234_v7  ;;  %v241_v10 = vrot.slane %v240_v8, 2  ;;  %vm288_vm2 = vcmp.eq.s32.totalorder %v279_v37, %v283_v44  ;;  %vm289_vm3 = vcmp.eq.s32.totalorder %v279_v37, %v287_v46  ;;  %p652_p4 = pneg %p651_p7  ;;  %p657_p12 = scmp.lt.s32.totalorder %s655_s8, %s649_s3 }
  0x62   : > { %v236_v11 = vrot.slane %v235_v9, 1  ;;  %v242_v12 = vmax.f32 %v240_v8, %v241_v10  ;;  %v321_v8 = vsub.s32 %v318_v3, %v279_v37  ;;  %p658_p1 = por %p657_p12, %p656_p10 }
  0x64   : > { %v237_v13 = vmax.f32 %v235_v9, %v236_v11  ;;  %v243_v14 = vrot.slane %v242_v12, 1  ;;  %p659_p2 = pnand %p658_p1, %p652_p4 }
  0x66   : > { %v244_v15 = vmax.f32 %v242_v12, %v243_v14 }
  0x68   : > { %v247_v16 = vcombine.low %v237_v13, %v244_v15 }
  0x6a   : > { %v249_v17 = vsub.f32 %v223_v0, %v247_v16 }
  0x6c   : > { %v250_v18 = vmul.f32 1.442695, %v249_v17 }
  0x6e   : > { %579 = vpow2.f32 %v250_v18 }
  0x78   : > { %v580_v19 = vpop.eup %579 }
  0x79   : > { %v253_v20 = vcombine.high %v580_v19, %v580_v19  ;;  %v255_v21 = vsel %vm230_vm0, %v580_v19, 0.0 }
  0x7a   : > { %v256_v22 = vrot.slane %v255_v21, 4 }
  0x7b   : > { %v262_v23 = vsel %vm230_vm0, %v253_v20, 0.0 }
  0x7c   : > { %v257_v24 = vadd.f32 %v256_v22, %v255_v21  ;;  %v263_v25 = vrot.slane %v262_v23, 4 }
  0x7e   : > { %v258_v26 = vrot.slane %v257_v24, 2  ;;  %v264_v27 = vadd.f32 %v263_v25, %v262_v23 }
  0x80   : > { %v259_v28 = vadd.f32 %v258_v26, %v257_v24  ;;  %v265_v29 = vrot.slane %v264_v27, 2 }
  0x82   : > { %v260_v30 = vrot.slane %v259_v28, 1  ;;  %v266_v31 = vadd.f32 %v265_v29, %v264_v27 }
  0x84   : > { %v261_v32 = vadd.f32 %v260_v30, %v259_v28  ;;  %v267_v33 = vrot.slane %v266_v31, 1 }
  0x86   : > { %v268_v34 = vadd.f32 %v267_v33, %v266_v31  ;;  %581 = vlog2.f32 %v261_v32 }
  0x88   : > { %583 = vlog2.f32 %v268_v34 }
  0x90   : > { %v582_v40 = vpop.eup %581 }
  0x91   : > { %v270_v42 = vmul.f32 0.6931472, %v582_v40 }
  0x92   : > { %v584_v43 = vpop.eup %583 }
  0x93   : > { %v272_v45 = vmul.f32 0.6931472, %v584_v43 }
  0x95   : > { %v275_v47 = vcombine.low %v270_v42, %v272_v45 }
  0x97   : > { %v277_v48 = vsub.f32 %v249_v17, %v275_v47 }
  0x99   : > { %v291_v49 = vcombine.high %v277_v48, %v277_v48  ;;  %v293_v50 = vsel %vm288_vm2, %v277_v48, 0.0 }
  0x9a   : > { %v295_v51 = vsel %vm230_vm0, %v293_v50, 0.0 }
  0x9b   : > { %v294_v52 = vsel %vm289_vm3, %v291_v49, 0.0  ;;  %v296_v53 = vrot.slane %v295_v51, 4 }
  0x9c   : > { %v302_v54 = vsel %vm230_vm0, %v294_v52, 0.0 }
  0x9d   : > { %v297_v55 = vadd.f32 %v296_v53, %v295_v51  ;;  %v303_v56 = vrot.slane %v302_v54, 4 }
  0x9f   : > { %v298_v57 = vrot.slane %v297_v55, 2  ;;  %v304_v58 = vadd.f32 %v303_v56, %v302_v54 }
  0xa1   : > { %v299_v59 = vadd.f32 %v298_v57, %v297_v55  ;;  %v305_v60 = vrot.slane %v304_v58, 2 }
  0xa3   : > { %v300_v63 = vrot.slane %v299_v59, 1  ;;  %v306_v0 = vadd.f32 %v305_v60, %v304_v58 }
  0xa5   : > { %v301_v1 = vadd.f32 %v300_v63, %v299_v59  ;;  %v307_v2 = vrot.slane %v306_v0, 1 }
  0xa7   : > { %v308_v4 = vadd.f32 %v307_v2, %v306_v0  ;;  %v309_v5 = vmul.f32 1.442695, %v301_v1  ;;  %v332_v6 = vmul.f32 -1.0, %v301_v1 }
  0xa9   : > { %585 = vpow2.f32 %v309_v5  ;;  %v311_v7 = vmul.f32 1.442695, %v308_v4  ;;  %v333_v9 = vmul.f32 -1.0, %v308_v4 }
  0xab   : > { %587 = vpow2.f32 %v311_v7  ;;  %v336_v10 = vcombine.low %v332_v6, %v333_v9 }
  0xad   : > { %v343_v11 = vrot.slane %v336_v10, %v321_v8 }
  0xaf   : > { %v350_v12 = vrot.slane %v343_v11, %v321_v8 }
  0xb1   : > { %v352_v13 = vsel %vm225_vm1, %v350_v12, 0.0 }
  0xb2   : > { %501 = vst.msk [vmem:[%s219_s19 + $0x1] ss:$2 sm:$0x3] %vm355_vm4, %v352_v13 }
  0xb3   : > { %v586_v14 = vpop.eup %585 }
  0xb5   : > { %v588_v15 = vpop.eup %587 }
  0xb6   : > { %v315_v16 = vcombine.low %v586_v14, %v588_v15 }
  0xb8   : > { %v322_v17 = vrot.slane %v315_v16, %v321_v8 }
  0xba   : > { %v329_v18 = vrot.slane %v322_v17, %v321_v8 }
  0xbc   : > { %v331_v19 = vsel %vm225_vm1, %v329_v18, 2.0 }
  0xbd   : > { %357 = vst.msk [vmem:[%s219_s19] ss:$2 sm:$0x3] %vm355_vm4, %v331_v19 }
  0xbe   : > { %662 = shalt.err (!%p659_p2)
}
  0xbf   : > { %s663_s15 = scalar_lea.hbm %s936_s28, 64  ;;  %s667_s6 = scalar_lea.hbm %s986_s2, 128 }
  0xc0   : > { %p664_p9 = scmp.ne.s32.totalorder %s936_s28, %s663_s15  ;;  %p668_p6 = scmp.lt.u32.totalorder %s936_s28, %s986_s2 }
  0xc1   : > { %p669_p13 = scmp.lt.u32.totalorder %s667_s6, %s663_s15  ;;  %p671_p8 = scmp.lt.u32.totalorder %s663_s15, %s936_s28 }
  0xc2   : > { %p665_p11 = pnand %p664_p9, %p999_p0 }
  0xc3   : > { %p670_p5 = por %p669_p13, %p668_p6 }
  0xc4   : > { %p666_p3 = pneg %p665_p11 }
  0xc5   : > { %p672_p7 = por %p671_p8, %p670_p5 }
  0xc7   : > { %p673_p4 = pnand %p672_p7, %p666_p3 }
  0xc9   : > { %676 = shalt.err (!%p673_p4)
}
  0xca   : > { %514 = dma.vmem_to_hbm [thread:$0]  (%p999_p0), %s931_s30, 64, %s936_s28, %s361_s25  }
  0xcb PF: > { %s389_s16 = sand.u32 1, %s715_s9   ;;  %p1000_p10 = scmp.ne.s32.totalorder %s992_s24, 0 }
  0xcc   : > { %p1001_p12 = scmp.ge.s32.totalorder %s735_s14, 2  ;;  %s390_s21 = scalar_lea.sflag [#allocation4], %s389_s16 }
  0xce   : > { %p524_p1 = pnand %p1001_p12, %p1000_p10 }
  0xd0   : > { %710 = dma.done.wait (!%p524_p1), %s390_s21, 64  }
  0xd1   : > { %712 = vsyncadd (!%p524_p1), %s390_s21, 4294967232  ;;  %s21_s14 = sadd.s32 1, %s735_s14   ;;  %s1002_s9 = smov %s719_s10 }
  0xd2   : > { %p18_p2 = scmp.ge.s32.totalorder %s21_s14, 4   ;;  %s1003_s10 = smov %s723_s11 }
  0xd3   : > { %s1004_s11 = smov %s812_s23  ;;  %s1005_s12 = smov %s731_s13 }
  0xd4   : > { %s1006_s13 = smov %s1008_s17  ;;  %20 = sbr.rel (!%p18_p2) target bundleno = 8 (0x8), region = 87 }
  0xdb   :  { %395 = vsyncpa [#allocation3], 1 }
  0xdc   :  { %397 = vsyncpa [#allocation3 + $0x1], 1 }
  0xdd   :  { %398 = vsyncpa [#allocation6], 1 }
  0xde   :  { %400 = vsyncpa [#allocation6 + $0x1], 1 }
  0xdf   :  { %401 = vsyncpa [#allocation4], 1 }
  0xe0   :  { %403 = vsyncpa [#allocation4 + $0x1], 1 }

</bundles_post_ra>
